<compile_context>
chip_gen: v5e
topology: v5e:2x2
jax: 0.10.0
libtpu: 0.0.40
codegen_flags: <defaults>
</compile_context>

<pallas_src>
import jax
import jax.numpy as jnp
from jax.experimental import pallas as pl
from jax.experimental.pallas import tpu as pltpu


def qnetwork_kernel(
    s_ref,                    # [TB, state_dim]
    a_ref,                    # [TB, action_dim]
    w1s_ref, w1a_ref, b1_ref,  # [S, 2H], [A, 2H], [1, 2H]   (layer1 of both branches)
    w2_ref, b2_ref,            # [2H, 2H] block-diag, [1, 2H]
    wq_ref, bq_ref,            # [2H, 2]  block-diag, [1, 2]
    q_ref,                     # [TB, 2]  (q1 || q2)
):
    # Layer 1 (both branches at once); state/action split replaces the concat.
    h = jnp.dot(s_ref[...], w1s_ref[...], preferred_element_type=jnp.float32)
    h = h + jnp.dot(a_ref[...], w1a_ref[...], preferred_element_type=jnp.float32)
    h = jnp.maximum(h + b1_ref[...], 0.0)

    # Layer 2 (block-diagonal => branches stay independent).
    h = jnp.dot(h, w2_ref[...], preferred_element_type=jnp.float32) + b2_ref[...]
    h = jnp.maximum(h, 0.0)

    # Output heads (block-diagonal [2H, 2]).
    q = jnp.dot(h, wq_ref[...], preferred_element_type=jnp.float32) + bq_ref[...]
    q_ref[...] = q.astype(q_ref.dtype)


def _round_up(x, m):
    return ((x + m - 1) // m) * m


def qnetwork_forward(state, action, params, *, tile_b=512):
    """Pallas implementation of QNetwork.forward(state, action) -> (q1, q2)."""
    state = state.astype(jnp.float32)
    action = action.astype(jnp.float32)
    B, S = state.shape
    A = action.shape[1]
    H = params["w2"].shape[0]
    H2 = 2 * H

    # --- Pack the twin-Q branches (tiny trace-time ops on the parameters). ---
    w1 = jnp.concatenate([params["w1"], params["w3"]], axis=1)       # [S+A, 2H]
    b1 = jnp.concatenate([params["b1"], params["b3"]], axis=1)       # [1, 2H]
    w1s, w1a = w1[:S], w1[S:]                                        # [S,2H],[A,2H]
    zH = jnp.zeros((H, H), jnp.float32)
    w2 = jnp.block([[params["w2"], zH], [zH, params["w4"]]])         # [2H, 2H]
    b2 = jnp.concatenate([params["b2"], params["b4"]], axis=1)       # [1, 2H]
    z1 = jnp.zeros((H, 1), jnp.float32)
    wq = jnp.block([[params["wq1"], z1], [z1, params["wq2"]]])       # [2H, 2]
    bq = jnp.concatenate([params["bq1"], params["bq2"]], axis=1)     # [1, 2]

    # --- Batch tiling: TB multiple of 8, pad B up to a multiple of TB. ---
    tb = min(tile_b, _round_up(B, 8))
    b_pad = _round_up(B, tb)
    if b_pad != B:
        pad = b_pad - B
        state = jnp.pad(state, ((0, pad), (0, 0)))
        action = jnp.pad(action, ((0, pad), (0, 0)))
    grid = (b_pad // tb,)

    def row_spec(d):
        return pl.BlockSpec((tb, d), lambda i: (i, 0))

    def const_spec(shape):
        return pl.BlockSpec(shape, lambda i: (0, 0))

    q = pl.pallas_call(
        qnetwork_kernel,
        out_shape=jax.ShapeDtypeStruct((b_pad, 2), jnp.float32),
        grid=grid,
        in_specs=[
            row_spec(S),             # state tile
            row_spec(A),             # action tile
            const_spec((S, H2)),     # w1 (state rows)   - resident
            const_spec((A, H2)),     # w1 (action rows)  - resident
            const_spec((1, H2)),     # b1
            const_spec((H2, H2)),    # w2 block-diag
            const_spec((1, H2)),     # b2
            const_spec((H2, 2)),     # wq block-diag
            const_spec((1, 2)),      # bq
        ],
        out_specs=row_spec(2),
        compiler_params=pltpu.CompilerParams(
            dimension_semantics=("parallel",)),
    )(state, action, w1s, w1a, b1, w2, b2, wq, bq)

    q = q[:B]
    return q[:, 0:1], q[:, 1:2]


def init_params(state_dim, action_dim, hidden_dim, key):
    """Deterministic synthetic init; nn.Linear-style (out,in) init, stored as
    (in, out) for the kernel's x @ W convention."""
    D = state_dim + action_dim
    H = hidden_dim
    ks = jax.random.split(key, 12)

    def linear(k_w, k_b, fan_in, fan_out):
        bound = 1.0 / jnp.sqrt(fan_in)
        w_torch = jax.random.uniform(
            k_w, (fan_out, fan_in), jnp.float32, -bound, bound)  # PyTorch (out, in)
        b = jax.random.uniform(k_b, (1, fan_out), jnp.float32, -bound, bound)
        return w_torch.T, b

    w1, b1 = linear(ks[0], ks[1], D, H)
    w2, b2 = linear(ks[2], ks[3], H, H)
    wq1, bq1 = linear(ks[4], ks[5], H, 1)
    w3, b3 = linear(ks[6], ks[7], D, H)
    w4, b4 = linear(ks[8], ks[9], H, H)
    wq2, bq2 = linear(ks[10], ks[11], H, 1)

    return dict(
        w1=w1, b1=b1, w2=w2, b2=b2, wq1=wq1, bq1=bq1,
        w3=w3, b3=b3, w4=w4, b4=b4, wq2=wq2, bq2=bq2,
    )


def reference_forward(state, action, p):
    """Pure-JAX reference mirroring the PyTorch forward."""
    x = jnp.concatenate([state, action], axis=1)
    h1 = jax.nn.relu(x @ p["w1"] + p["b1"])
    h1 = jax.nn.relu(h1 @ p["w2"] + p["b2"])
    q1 = h1 @ p["wq1"] + p["bq1"]
    h2 = jax.nn.relu(x @ p["w3"] + p["b3"])
    h2 = jax.nn.relu(h2 @ p["w4"] + p["b4"])
    q2 = h2 @ p["wq2"] + p["bq2"]
    return q1, q2


def _check(batch, state_dim, action_dim, hidden_dim, key, tile_b):
    k_params, k_state, k_action = jax.random.split(key, 3)
    params = init_params(state_dim, action_dim, hidden_dim, k_params)
    state = jax.random.normal(k_state, (batch, state_dim), jnp.float32)
    action = jax.random.normal(k_action, (batch, action_dim), jnp.float32)

    q1, q2 = qnetwork_forward(state, action, params, tile_b=tile_b)
    q1 = jax.block_until_ready(q1)
    q2 = jax.block_until_ready(q2)

    q1_ref, q2_ref = reference_forward(state, action, params)
    assert q1.shape == (batch, 1) and q2.shape == (batch, 1)
    assert jnp.allclose(q1, q1_ref, atol=2e-5, rtol=1e-5)
    assert jnp.allclose(q2, q2_ref, atol=2e-5, rtol=1e-5)


if __name__ == "__main__":
    key = jax.random.PRNGKey(0)
    k0, k1 = jax.random.split(key)

    # Small primary check (batch=2, hidden=32) — single grid step.
    _check(batch=2, state_dim=8, action_dim=4, hidden_dim=32, key=k0, tile_b=512)

    # Secondary check exercising multiple grid steps and a padded final tile.
    _check(batch=600, state_dim=8, action_dim=4, hidden_dim=32, key=k1, tile_b=256)

    print("KERNEL_OK")
</pallas_src>

<mosaic_0001>
module attributes {stable_mosaic.version = 11 : i64} {
  func.func @qnetwork_kernel(%arg0: i32, %arg1: memref<8x8xf32, #tpu.memory_space<vmem>>, %arg2: memref<8x4xf32, #tpu.memory_space<vmem>>, %arg3: memref<8x64xf32, #tpu.memory_space<vmem>>, %arg4: memref<4x64xf32, #tpu.memory_space<vmem>>, %arg5: memref<1x64xf32, #tpu.memory_space<vmem>>, %arg6: memref<64x64xf32, #tpu.memory_space<vmem>>, %arg7: memref<1x64xf32, #tpu.memory_space<vmem>>, %arg8: memref<64x2xf32, #tpu.memory_space<vmem>>, %arg9: memref<1x2xf32, #tpu.memory_space<vmem>>, %arg10: memref<8x2xf32, #tpu.memory_space<vmem>>) attributes {dimension_semantics = [#tpu.dimension_semantics<parallel>], iteration_bounds = array<i64: 1>, scalar_prefetch = 0 : i64, scratch_operands = 0 : i64, tpu.core_type = #tpu.core_type<tc>, window_params = [{transform_indices = @transform_0, window_bounds = array<i64: 8, 8>}, {transform_indices = @transform_1, window_bounds = array<i64: 8, 4>}, {pipeline_mode = #tpu.pipeline_mode<synchronous>, transform_indices = @transform_2, window_bounds = array<i64: 8, 64>}, {pipeline_mode = #tpu.pipeline_mode<synchronous>, transform_indices = @transform_3, window_bounds = array<i64: 4, 64>}, {pipeline_mode = #tpu.pipeline_mode<synchronous>, transform_indices = @transform_4, window_bounds = array<i64: 1, 64>}, {pipeline_mode = #tpu.pipeline_mode<synchronous>, transform_indices = @transform_5, window_bounds = array<i64: 64, 64>}, {pipeline_mode = #tpu.pipeline_mode<synchronous>, transform_indices = @transform_6, window_bounds = array<i64: 1, 64>}, {pipeline_mode = #tpu.pipeline_mode<synchronous>, transform_indices = @transform_7, window_bounds = array<i64: 64, 2>}, {pipeline_mode = #tpu.pipeline_mode<synchronous>, transform_indices = @transform_8, window_bounds = array<i64: 1, 2>}, {transform_indices = @transform_9, window_bounds = array<i64: 8, 2>}]} {
    %c0 = arith.constant 0 : index
    %c0_0 = arith.constant 0 : index
    %0 = vector.load %arg1[%c0, %c0_0] : memref<8x8xf32, #tpu.memory_space<vmem>>, vector<8x8xf32>
    %c0_1 = arith.constant 0 : index
    %c0_2 = arith.constant 0 : index
    %1 = vector.load %arg3[%c0_1, %c0_2] : memref<8x64xf32, #tpu.memory_space<vmem>>, vector<8x64xf32>
    %cst = arith.constant dense<0.000000e+00> : vector<8x64xf32>
    %2 = tpu.matmul %0, %1, %cst {dimension_numbers = #tpu.dot_dimension_numbers<[1], [0], [0], [1], [0, 0, 1, 1], [], []>} : vector<8x8xf32>, vector<8x64xf32>, vector<8x64xf32> -> vector<8x64xf32>
    %c0_3 = arith.constant 0 : index
    %c0_4 = arith.constant 0 : index
    %3 = vector.load %arg2[%c0_3, %c0_4] : memref<8x4xf32, #tpu.memory_space<vmem>>, vector<8x4xf32>
    %c0_5 = arith.constant 0 : index
    %c0_6 = arith.constant 0 : index
    %4 = vector.load %arg4[%c0_5, %c0_6] : memref<4x64xf32, #tpu.memory_space<vmem>>, vector<4x64xf32>
    %cst_7 = arith.constant dense<0.000000e+00> : vector<8x64xf32>
    %5 = tpu.matmul %3, %4, %cst_7 {dimension_numbers = #tpu.dot_dimension_numbers<[1], [0], [0], [1], [0, 0, 1, 1], [], []>} : vector<8x4xf32>, vector<4x64xf32>, vector<8x64xf32> -> vector<8x64xf32>
    %6 = arith.addf %2, %5 : vector<8x64xf32>
    %c0_8 = arith.constant 0 : index
    %c0_9 = arith.constant 0 : index
    %7 = vector.load %arg5[%c0_8, %c0_9] : memref<1x64xf32, #tpu.memory_space<vmem>>, vector<1x64xf32>
    %8 = vector.broadcast %7 : vector<1x64xf32> to vector<8x64xf32>
    %9 = arith.addf %6, %8 : vector<8x64xf32>
    %cst_10 = arith.constant 0.000000e+00 : f32
    %10 = vector.broadcast %cst_10 : f32 to vector<8x64xf32>
    %11 = arith.maximumf %9, %10 : vector<8x64xf32>
    %c0_11 = arith.constant 0 : index
    %c0_12 = arith.constant 0 : index
    %12 = vector.load %arg6[%c0_11, %c0_12] : memref<64x64xf32, #tpu.memory_space<vmem>>, vector<64x64xf32>
    %cst_13 = arith.constant dense<0.000000e+00> : vector<8x64xf32>
    %13 = tpu.matmul %11, %12, %cst_13 {dimension_numbers = #tpu.dot_dimension_numbers<[1], [0], [0], [1], [0, 0, 1, 1], [], []>} : vector<8x64xf32>, vector<64x64xf32>, vector<8x64xf32> -> vector<8x64xf32>
    %c0_14 = arith.constant 0 : index
    %c0_15 = arith.constant 0 : index
    %14 = vector.load %arg7[%c0_14, %c0_15] : memref<1x64xf32, #tpu.memory_space<vmem>>, vector<1x64xf32>
    %15 = vector.broadcast %14 : vector<1x64xf32> to vector<8x64xf32>
    %16 = arith.addf %13, %15 : vector<8x64xf32>
    %cst_16 = arith.constant 0.000000e+00 : f32
    %17 = vector.broadcast %cst_16 : f32 to vector<8x64xf32>
    %18 = arith.maximumf %16, %17 : vector<8x64xf32>
    %c0_17 = arith.constant 0 : index
    %c0_18 = arith.constant 0 : index
    %19 = vector.load %arg8[%c0_17, %c0_18] : memref<64x2xf32, #tpu.memory_space<vmem>>, vector<64x2xf32>
    %cst_19 = arith.constant dense<0.000000e+00> : vector<8x2xf32>
    %20 = tpu.matmul %18, %19, %cst_19 {dimension_numbers = #tpu.dot_dimension_numbers<[1], [0], [0], [1], [0, 0, 1, 1], [], []>} : vector<8x64xf32>, vector<64x2xf32>, vector<8x2xf32> -> vector<8x2xf32>
    %c0_20 = arith.constant 0 : index
    %c0_21 = arith.constant 0 : index
    %21 = vector.load %arg9[%c0_20, %c0_21] : memref<1x2xf32, #tpu.memory_space<vmem>>, vector<1x2xf32>
    %22 = vector.broadcast %21 : vector<1x2xf32> to vector<8x2xf32>
    %23 = arith.addf %20, %22 : vector<8x2xf32>
    %c0_22 = arith.constant 0 : index
    %c0_23 = arith.constant 0 : index
    %24 = vector.load %arg10[%c0_22, %c0_23] : memref<8x2xf32, #tpu.memory_space<vmem>>, vector<8x2xf32>
    tpu.vector_store %arg10[%c0_22, %c0_23], %23 {strides = array<i32>} : memref<8x2xf32, #tpu.memory_space<vmem>>, vector<8x2xf32>,
    return
  }
  func.func @transform_0(%arg0: i32) -> (i32, i32) {
    %c0_i32 = arith.constant 0 : i32
    %c0_i32_0 = arith.constant 0 : i32
    return %arg0, %c0_i32 : i32, i32
  }
  func.func @transform_1(%arg0: i32) -> (i32, i32) {
    %c0_i32 = arith.constant 0 : i32
    %c0_i32_0 = arith.constant 0 : i32
    return %arg0, %c0_i32 : i32, i32
  }
  func.func @transform_2(%arg0: i32) -> (i32, i32) {
    %c0_i32 = arith.constant 0 : i32
    %c0_i32_0 = arith.constant 0 : i32
    %c0_i32_1 = arith.constant 0 : i32
    return %c0_i32, %c0_i32_0 : i32, i32
  }
  func.func @transform_3(%arg0: i32) -> (i32, i32) {
    %c0_i32 = arith.constant 0 : i32
    %c0_i32_0 = arith.constant 0 : i32
    %c0_i32_1 = arith.constant 0 : i32
    return %c0_i32, %c0_i32_0 : i32, i32
  }
  func.func @transform_4(%arg0: i32) -> (i32, i32) {
    %c0_i32 = arith.constant 0 : i32
    %c0_i32_0 = arith.constant 0 : i32
    %c0_i32_1 = arith.constant 0 : i32
    return %c0_i32, %c0_i32_0 : i32, i32
  }
  func.func @transform_5(%arg0: i32) -> (i32, i32) {
    %c0_i32 = arith.constant 0 : i32
    %c0_i32_0 = arith.constant 0 : i32
    %c0_i32_1 = arith.constant 0 : i32
    return %c0_i32, %c0_i32_0 : i32, i32
  }
  func.func @transform_6(%arg0: i32) -> (i32, i32) {
    %c0_i32 = arith.constant 0 : i32
    %c0_i32_0 = arith.constant 0 : i32
    %c0_i32_1 = arith.constant 0 : i32
    return %c0_i32, %c0_i32_0 : i32, i32
  }
  func.func @transform_7(%arg0: i32) -> (i32, i32) {
    %c0_i32 = arith.constant 0 : i32
    %c0_i32_0 = arith.constant 0 : i32
    %c0_i32_1 = arith.constant 0 : i32
    return %c0_i32, %c0_i32_0 : i32, i32
  }
  func.func @transform_8(%arg0: i32) -> (i32, i32) {
    %c0_i32 = arith.constant 0 : i32
    %c0_i32_0 = arith.constant 0 : i32
    %c0_i32_1 = arith.constant 0 : i32
    return %c0_i32, %c0_i32_0 : i32, i32
  }
  func.func @transform_9(%arg0: i32) -> (i32, i32) {
    %c0_i32 = arith.constant 0 : i32
    %c0_i32_0 = arith.constant 0 : i32
    return %arg0, %c0_i32 : i32, i32
  }
}

</mosaic_0001>

<bundles_post_ra>
// kernel: tpu_custom_call.1
= control target key start
LH: loop header
LB: loop body
LE: loop exit
PB: predicated region body
PF: predicated region fallthrough
CT: control target
= control target key end

     0   :  { %14 = vsyncpa [#allocation3], 0  ;;  %s222_s12 = smov [#allocation2]   ;;  %s345_s0 = inlined_call_operand.vmem [shape: f32[8,8], index: 0, kind: input, shape index: {}]   ;;  %s346_s1 = inlined_call_operand.vmem [shape: f32[8,4], index: 1, kind: input, shape index: {}]   ;;  %s347_s2 = inlined_call_operand.hbm [shape: f32[8,64], index: 2, kind: input, shape index: {}]   ;;  %s348_s3 = inlined_call_operand.vmem [shape: f32[4,64], index: 3, kind: input, shape index: {}]   ;;  %s349_s4 = inlined_call_operand.vmem [shape: f32[1,64], index: 4, kind: input, shape index: {}]   ;;  %s350_s5 = inlined_call_operand.vmem [shape: f32[64,64], index: 5, kind: input, shape index: {}]   ;;  %s351_s6 = inlined_call_operand.vmem [shape: f32[1,64], index: 6, kind: input, shape index: {}]   ;;  %s352_s7 = inlined_call_operand.vmem [shape: f32[64,2], index: 7, kind: input, shape index: {}]   ;;  %s353_s8 = inlined_call_operand.vmem [shape: f32[1,2], index: 8, kind: input, shape index: {}]   ;;  %s354_s9 = inlined_call_operand.vmem [shape: f32[8,2], index: 9, kind: output, shape index: {}]  }
   0x1   :  { %s24_s11 = sshll.u32 %s347_s2, 4  ;;  %s26_s13 = sshll.u32 %s222_s12, 4  ;;  %s25_s11 = int_to_ptr.hbm [resolvable:$true] %s24_s11  ;;  %s27_s13 = int_to_ptr.vmem [resolvable:$true] %s26_s13 }
   0x2   :  { %29 = dma.hbm_to_vmem [thread:$0]  %s25_s11, 128, %s27_s13, [#allocation3]  }
   0x3   :  { %220 = dma.done.wait [#allocation3], 128  }
   0x4   :  { %221 = vsyncadd [#allocation3], 4294967168  ;;  %vm54_vm0 = vcmask 1043456   ;;  %vm50_vm1 = vcmask 31744   ;;  %vm78_vm2 = vcmask 64512   ;;  %v47_v1 = vld [vmem:[#allocation2] sm:$0xff] }
   0x5   :  { %v49_v0 = vld [vmem:[%s348_s3] sm:$0xf]  ;;  %97 = vmatpush.msra.mxu1 %v47_v1  ;;  %v115_v4 = vld [vmem:[%s350_s5 + $0x38] sm:$0xff]  ;;  %v114_v5 = vld [vmem:[%s350_s5 + $0x30] sm:$0xff]  ;;  %vm120_vm3 = vcmask 523264   ;;  %vm180_vm4 = vcmask 15360  }
   0x6   :  { %v48_v2 = vld [vmem:[%s346_s1] sm:$0xff]  ;;  %187 = vmatpush.msk.msra.mxu0 %vm54_vm0, %v49_v0  ;;  %132 = vmatpush.msra.mxu2 %v115_v4  ;;  %v113_v6 = vld [vmem:[%s350_s5 + $0x28] sm:$0xff]  ;;  %v111_v8 = vld [vmem:[%s350_s5 + $0x18] sm:$0xff] }
   0x7   :  { %v46_v3 = vld [vmem:[%s345_s0] sm:$0xff]  ;;  %188 = vmatmul.msk.f32.vlgmr.msra.gmra.mxu0 %vm50_vm1, %v48_v2  ;;  %v110_v9 = vld [vmem:[%s350_s5 + $0x10] sm:$0xff]  ;;  %v109_v10 = vld [vmem:[%s350_s5 + $0x8] sm:$0xff] }
   0x8   :  { %189 = vmatmul.msk.f32.vlgmr.msra.gmra.mxu1 %vm78_vm2, %v46_v3  ;;  %133 = vmatpush.msra.mxu2 %v114_v5  ;;  %v112_v7 = vld [vmem:[%s350_s5 + $0x20] sm:$0xff]  ;;  %v152_v12 = vld [vmem:[%s352_s7 + $0x38] sm:$0xff]  ;;  %v151_v13 = vld [vmem:[%s352_s7 + $0x30] sm:$0xff] }
   0x9   :  { %v108_v11 = vld [vmem:[%s350_s5] sm:$0xff]  ;;  %168 = vmatpush.msra.mxu3 %v152_v12  ;;  %v150_v14 = vld [vmem:[%s352_s7 + $0x28] sm:$0xff]  ;;  %v148_v16 = vld [vmem:[%s352_s7 + $0x18] sm:$0xff] }
   0xa   :  { %134 = vmatpush.msra.mxu2 %v113_v6  ;;  %v149_v15 = vld [vmem:[%s352_s7 + $0x20] sm:$0xff]  ;;  %v147_v23 = vld [vmem:[%s352_s7 + $0x10] sm:$0xff]  ;;  %v146_v24 = vld [vmem:[%s352_s7 + $0x8] sm:$0xff] }
   0xb   :  { %169 = vmatpush.msra.mxu3 %v151_v13  ;;  %v193_v17 = vld [vmem:[%s349_s4] ss:$0 sm:$0xff] }
   0xc   :  { %135 = vmatpush.msra.mxu2 %v112_v7  ;;  %v145_v25 = vld [vmem:[%s352_s7] sm:$0xff] }
   0xd   :  { %170 = vmatpush.msra.mxu3 %v150_v14  ;;  %v194_v26 = vld [vmem:[%s351_s6] ss:$0 sm:$0xff] }
   0xe   :  { %136 = vmatpush.msra.mxu2 %v111_v8  ;;  %v195_v30 = vld [vmem:[%s353_s8] ss:$0 sm:$0xff] }
   0xf   :  { %171 = vmatpush.msra.mxu3 %v149_v15 }
  0x10   :  { %137 = vmatpush.msra.mxu2 %v110_v9 }
  0x11   :  { %172 = vmatpush.msra.mxu3 %v148_v16 }
  0x12   :  { %138 = vmatpush.msra.mxu2 %v109_v10 }
  0x13   :  { %173 = vmatpush.msra.mxu3 %v147_v23 }
  0x14   :  { %139 = vmatpush.msra.mxu2 %v108_v11 }
  0x15   :  { %174 = vmatpush.msra.mxu3 %v146_v24 }
  0x17   :  { %175 = vmatpush.msra.mxu3 %v145_v25 }
  0x84   :  { %v75_v18 = vpop.f32.mrf.mxu0 }
  0x85   :  { %v99_v19 = vpop.f32.mrf.mxu1 }
  0x86   :  { %v100_v20 = vadd.f32 %v99_v19, %v75_v18 }
  0x88   :  { %v106_v21 = vadd.f32 %v193_v17, %v100_v20 }
  0x8a   :  { %v107_v22 = vmax.f32 %v106_v21, 0.0 }
  0x8c   :  { %190 = vmatmul.msk.f32.vlgmr.msra.gmra.mxu2 %vm120_vm3, %v107_v22 }
 0x10f   :  { %v141_v27 = vpop.f32.mrf.mxu2 }
 0x110   :  { %v142_v28 = vadd.f32 %v194_v26, %v141_v27 }
 0x112   :  { %v144_v29 = vmax.f32 %v142_v28, 0.0 }
 0x114   :  { %191 = vmatmul.msk.f32.vlgmr.msra.gmra.mxu3 %vm120_vm3, %v144_v29 }
 0x197   :  { %v177_v31 = vpop.f32.mrf.mxu3 }
 0x198   :  { %v178_v32 = vadd.f32 %v195_v30, %v177_v31 }
 0x19a   :  { %181 = vst.msk [vmem:[%s354_s9] sm:$0xff] %vm180_vm4, %v178_v32 }
 0x19b   :  { %186 = vsyncpa [#allocation3], 1 }

</bundles_post_ra>
